<compile_context>
chip_gen: v6e
topology: v6e:2x2x1
jax: 0.10.0
libtpu: 0.0.40
codegen_flags: <defaults>
</compile_context>

<pallas_src>
import jax
import jax.numpy as jnp
from jax.experimental import pallas as pl
from jax.experimental.pallas import tpu as pltpu

EPS = 1e-5


def _round_up(v, m):
    return (v + m - 1) // m * m


# -----------------------------------------------------------------------------
# Stats pass, Gram form (used when C_in <= C_out):
#   G = sum_m x[m,:]^T x[m,:]   (C_in, C_in),   s = sum_m x[m,:]   (1, C_in)
# Channel sums of y = x @ W are recovered in the wrapper:
#   sum(y) = s @ W,   sum(y^2) = colsum(W * (G @ W))
# -----------------------------------------------------------------------------
def _gram_stats_kernel(m_ref, x_ref, g_ref, s_ref):
    i = pl.program_id(0)

    @pl.when(i == 0)
    def _init():
        g_ref[...] = jnp.zeros_like(g_ref)
        s_ref[...] = jnp.zeros_like(s_ref)

    tm = x_ref.shape[0]
    rows = i * tm + jax.lax.broadcasted_iota(jnp.int32, (tm, 1), 0)
    x = x_ref[...]
    xs = jnp.where(rows < m_ref[0], x, jnp.zeros_like(x))  # mask ragged last tile

    # x^T x on the MXU (contraction over the row axis), f32 accumulation.
    g_ref[...] += jax.lax.dot_general(
        xs, xs, (((0,), (0,)), ((), ())), preferred_element_type=jnp.float32)
    s_ref[...] += jnp.sum(xs.astype(jnp.float32), axis=0, keepdims=True)


# -----------------------------------------------------------------------------
# Stats pass, y form (fallback when C_in > C_out, where the Gram matrix would cost
# more FLOPs than the y statistics): ysum = sum_m y, ysq = sum_m y^2, y = x @ W.
# Channel sums go through the MXU (ones-row matmul) instead of sublane reductions.
# TODO(synk): for C_in >> C_out a further win is stashing y to HBM in this pass and
# aliasing it back into the normalize pass instead of recomputing x @ W.
# -----------------------------------------------------------------------------
def _y_stats_kernel(m_ref, x_ref, w_ref, ysum_ref, ysq_ref):
    i = pl.program_id(0)

    @pl.when(i == 0)
    def _init():
        ysum_ref[...] = jnp.zeros_like(ysum_ref)
        ysq_ref[...] = jnp.zeros_like(ysq_ref)

    tm = x_ref.shape[0]
    rows = i * tm + jax.lax.broadcasted_iota(jnp.int32, (tm, 1), 0)
    x = x_ref[...]
    xs = jnp.where(rows < m_ref[0], x, jnp.zeros_like(x))

    y = jnp.dot(xs, w_ref[...], preferred_element_type=jnp.float32)
    ones_row = jnp.ones((1, tm), jnp.float32)
    ysum_ref[...] += jnp.dot(ones_row, y, preferred_element_type=jnp.float32)
    ysq_ref[...] += jnp.dot(ones_row, y * y, preferred_element_type=jnp.float32)


# -----------------------------------------------------------------------------
# Normalize pass: y = x @ W, folded BN (y*scale + shift), ReLU. Row-parallel.
# -----------------------------------------------------------------------------
def _normalize_kernel(x_ref, w_ref, scale_ref, shift_ref, o_ref):
    y = jnp.dot(x_ref[...], w_ref[...], preferred_element_type=jnp.float32)
    y = y * scale_ref[...] + shift_ref[...]
    o_ref[...] = jnp.maximum(y, 0.0).astype(o_ref.dtype)


def _pick_tm(M, C_in, C_out, itemsize, requested=None):
    if requested is None:
        # Default targets v5e/v6e (128 MiB VMEM); shrink until the per-step estimate
        # (double-buffered x/out streams + single-buffered W) fits ~24 MiB so the same
        # tiling also pipelines under v7x's 32 MiB default scoped VMEM.
        # TODO(synk): per-generation tuning (pltpu.get_tpu_info) could push tm to 2048
        # on v5e/v6e and re-derive the cap against v7x's 64 MiB physical VMEM.
        tm = 1024
        budget = 24 * 1024 * 1024
        fixed = C_in * C_out * itemsize
        while tm > 256 and 2 * tm * (C_in + C_out) * itemsize + fixed > budget:
            tm //= 2
    else:
        tm = requested
    tm = max(8, min(tm, _round_up(M, 8)))
    return _round_up(tm, 8)


def _compiler_params(semantics, est_bytes):
    vmem_limit = None
    if est_bytes > 24 * 1024 * 1024:
        vmem_limit = min(max(int(est_bytes * 3 // 2), 32 * 1024 * 1024),
                         48 * 1024 * 1024)
    return pltpu.CompilerParams(dimension_semantics=semantics,
                                vmem_limit_bytes=vmem_limit)


def shared_fc_block(x, weight, gamma, beta, *, tm=None):
    """x: (B, N, C_in); weight: (C_out, C_in, 1) as nn.Conv1d; gamma/beta: (C_out,)."""
    B, N, C_in = x.shape
    C_out = weight.shape[0]
    M = B * N
    itemsize = jnp.dtype(x.dtype).itemsize

    tm = _pick_tm(M, C_in, C_out, itemsize, tm)
    nt = pl.cdiv(M, tm)

    x2d = x.reshape(M, C_in)                    # free reshape, no pad / extra HBM copy
    w2d = weight[:, :, 0].T.astype(x.dtype)     # (C_in, C_out), MXU-native dtype
    m_arr = jnp.array([M], dtype=jnp.int32)     # scalar-prefetch mask bound

    # ---- pass 1: batch statistics ------------------------------------------------
    use_gram = (C_in <= C_out) and (C_in <= 2048)   # keep the Gram accumulator small
    if use_gram:
        g, s = pl.pallas_call(
            _gram_stats_kernel,
            out_shape=(jax.ShapeDtypeStruct((C_in, C_in), jnp.float32),
                       jax.ShapeDtypeStruct((1, C_in), jnp.float32)),
            grid_spec=pltpu.PrefetchScalarGridSpec(
                num_scalar_prefetch=1,
                grid=(nt,),
                in_specs=[pl.BlockSpec((tm, C_in), lambda i, m: (i, 0))],
                out_specs=(pl.BlockSpec((C_in, C_in), lambda i, m: (0, 0)),
                           pl.BlockSpec((1, C_in), lambda i, m: (0, 0))),
            ),
            compiler_params=_compiler_params(
                ("arbitrary",), 2 * tm * C_in * itemsize + C_in * C_in * 4),
        )(m_arr, x2d)
        w32 = w2d.astype(jnp.float32)
        ch_sum = s @ w32                                              # (1, C_out)
        ch_sumsq = jnp.sum(w32 * (g @ w32), axis=0, keepdims=True)    # (1, C_out)
    else:
        ch_sum, ch_sumsq = pl.pallas_call(
            _y_stats_kernel,
            out_shape=(jax.ShapeDtypeStruct((1, C_out), jnp.float32),
                       jax.ShapeDtypeStruct((1, C_out), jnp.float32)),
            grid_spec=pltpu.PrefetchScalarGridSpec(
                num_scalar_prefetch=1,
                grid=(nt,),
                in_specs=[
                    pl.BlockSpec((tm, C_in), lambda i, m: (i, 0)),
                    pl.BlockSpec((C_in, C_out), lambda i, m: (0, 0),
                                 pipeline_mode=pl.Buffered(1)),
                ],
                out_specs=(pl.BlockSpec((1, C_out), lambda i, m: (0, 0)),
                           pl.BlockSpec((1, C_out), lambda i, m: (0, 0))),
            ),
            compiler_params=_compiler_params(
                ("arbitrary",),
                2 * tm * C_in * itemsize + C_in * C_out * itemsize),
        )(m_arr, x2d, w2d)

    # ---- tiny finalize: fold BN into per-channel scale/shift (pure f32 JAX) -------
    inv_m = 1.0 / float(M)
    mean = ch_sum * inv_m
    var = jnp.maximum(ch_sumsq * inv_m - mean * mean, 0.0)
    scale = gamma.astype(jnp.float32).reshape(1, C_out) * jax.lax.rsqrt(var + EPS)
    shift = beta.astype(jnp.float32).reshape(1, C_out) - mean * scale

    # ---- pass 2: y = x @ W, folded-BN FMA epilogue, ReLU ---------------------------
    est = (2 * tm * (C_in + C_out) * itemsize + C_in * C_out * itemsize
           + 2 * C_out * 4)
    out = pl.pallas_call(
        _normalize_kernel,
        out_shape=jax.ShapeDtypeStruct((M, C_out), x.dtype),
        grid_spec=pltpu.PrefetchScalarGridSpec(
            num_scalar_prefetch=0,
            grid=(nt,),
            in_specs=[
                pl.BlockSpec((tm, C_in), lambda i: (i, 0)),
                pl.BlockSpec((C_in, C_out), lambda i: (0, 0),
                             pipeline_mode=pl.Buffered(1)),
                pl.BlockSpec((1, C_out), lambda i: (0, 0),
                             pipeline_mode=pl.Buffered(1)),
                pl.BlockSpec((1, C_out), lambda i: (0, 0),
                             pipeline_mode=pl.Buffered(1)),
            ],
            out_specs=pl.BlockSpec((tm, C_out), lambda i: (i, 0)),
        ),
        compiler_params=_compiler_params(("parallel",), est),
    )(x2d, w2d, scale, shift)

    return out.reshape(B, N, C_out)


def reference(x, weight, gamma, beta):
    """Pure-JAX reference matching the PyTorch training-mode forward."""
    w2d = weight[:, :, 0].T
    y = jnp.einsum("bnc,cd->bnd", x.astype(jnp.float32), w2d.astype(jnp.float32))
    mean = jnp.mean(y, axis=(0, 1), keepdims=True)
    var = jnp.mean((y - mean) ** 2, axis=(0, 1), keepdims=True)
    y = (y - mean) * jax.lax.rsqrt(var + EPS)
    y = y * gamma.reshape(1, 1, -1) + beta.reshape(1, 1, -1)
    return jnp.maximum(y, 0.0)


if __name__ == "__main__":
    key = jax.random.PRNGKey(0)

    def init_params(k, C_in, C_out):
        kw, kg, kb = jax.random.split(k, 3)
        bound = 1.0 / jnp.sqrt(jnp.float32(C_in))
        weight = jax.random.uniform(kw, (C_out, C_in, 1), jnp.float32, -bound, bound)
        gamma = 1.0 + 0.1 * jax.random.normal(kg, (C_out,), dtype=jnp.float32)
        beta = 0.1 * jax.random.normal(kb, (C_out,), dtype=jnp.float32)
        return weight, gamma, beta

    k1, k2, k3, k4 = jax.random.split(key, 4)

    # Case 1: C_in < C_out -> Gram-statistics path, exact row tiles.
    B, N, C_in, C_out = 2, 8, 16, 32
    x = jax.random.normal(k1, (B, N, C_in), dtype=jnp.float32)
    weight, gamma, beta = init_params(k2, C_in, C_out)
    out = jax.block_until_ready(shared_fc_block(x, weight, gamma, beta))
    ref = reference(x, weight, gamma, beta)
    assert out.shape == (B, N, C_out)
    assert jnp.allclose(out, ref, atol=1e-4, rtol=1e-4), "gram-path mismatch vs reference"

    # Case 2: C_in > C_out -> y-statistics path, with a ragged (masked) last row tile.
    B, N, C_in, C_out = 2, 11, 32, 16
    x = jax.random.normal(k3, (B, N, C_in), dtype=jnp.float32)
    weight, gamma, beta = init_params(k4, C_in, C_out)
    out = jax.block_until_ready(shared_fc_block(x, weight, gamma, beta))
    ref = reference(x, weight, gamma, beta)
    assert out.shape == (B, N, C_out)
    assert jnp.allclose(out, ref, atol=1e-4, rtol=1e-4), "y-path mismatch vs reference"

    print("KERNEL_OK")
</pallas_src>

<mosaic_0001>
module attributes {stable_mosaic.version = 11 : i64} {
  func.func @_gram_stats_kernel(%arg0: i32, %arg1: memref<1xi32, #tpu.memory_space<smem>>, %arg2: memref<16x16xf32, #tpu.memory_space<vmem>>, %arg3: memref<16x16xf32, #tpu.memory_space<vmem>>, %arg4: memref<1x16xf32, #tpu.memory_space<vmem>>) attributes {dimension_semantics = [#tpu.dimension_semantics<arbitrary>], iteration_bounds = array<i64: 1>, scalar_prefetch = 1 : i64, scratch_operands = 0 : i64, tpu.core_type = #tpu.core_type<tc>, window_params = [{transform_indices = @transform_0, window_bounds = array<i64: 16, 16>}, {pipeline_mode = #tpu.pipeline_mode<synchronous>, transform_indices = @transform_1, window_bounds = array<i64: 16, 16>}, {pipeline_mode = #tpu.pipeline_mode<synchronous>, transform_indices = @transform_2, window_bounds = array<i64: 1, 16>}]} {
    %c0_i32 = arith.constant 0 : i32
    %0 = arith.cmpi eq, %arg0, %c0_i32 : i32
    %1 = arith.extui %0 : i1 to i32
    %c0_i32_0 = arith.constant 0 : i32
    %2 = arith.cmpi ne, %1, %c0_i32_0 : i32
    scf.if %2 {
      %cst_13 = arith.constant 0.000000e+00 : f32
      %24 = vector.broadcast %cst_13 : f32 to vector<16x16xf32>
      %c0_14 = arith.constant 0 : index
      %c0_15 = arith.constant 0 : index
      %25 = vector.load %arg3[%c0_14, %c0_15] : memref<16x16xf32, #tpu.memory_space<vmem>>, vector<16x16xf32>
      tpu.vector_store %arg3[%c0_14, %c0_15], %24 {strides = array<i32>} : memref<16x16xf32, #tpu.memory_space<vmem>>, vector<16x16xf32>,
      %cst_16 = arith.constant 0.000000e+00 : f32
      %26 = vector.broadcast %cst_16 : f32 to vector<1x16xf32>
      %c0_17 = arith.constant 0 : index
      %c0_18 = arith.constant 0 : index
      %27 = vector.load %arg4[%c0_17, %c0_18] : memref<1x16xf32, #tpu.memory_space<vmem>>, vector<1x16xf32>
      tpu.vector_store %arg4[%c0_17, %c0_18], %26 {strides = array<i32>} : memref<1x16xf32, #tpu.memory_space<vmem>>, vector<1x16xf32>,
    } else {
    }
    %c16_i32 = arith.constant 16 : i32
    %3 = arith.muli %arg0, %c16_i32 : i32
    %4 = tpu.iota {dimensions = array<i32: 0>} : vector<16x1xi32>
    %5 = vector.broadcast %3 : i32 to vector<16x1xi32>
    %6 = arith.addi %5, %4 : vector<16x1xi32>
    %c0 = arith.constant 0 : index
    %c0_1 = arith.constant 0 : index
    %7 = vector.load %arg2[%c0, %c0_1] : memref<16x16xf32, #tpu.memory_space<vmem>>, vector<16x16xf32>
    %c0_2 = arith.constant 0 : index
    %8 = memref.load %arg1[%c0_2] : memref<1xi32, #tpu.memory_space<smem>>
    %9 = vector.broadcast %8 : i32 to vector<16x1xi32>
    %10 = arith.cmpi slt, %6, %9 : vector<16x1xi32>
    %cst = arith.constant 0.000000e+00 : f32
    %11 = vector.broadcast %cst : f32 to vector<16x16xf32>
    %12 = vector.shape_cast %10 : vector<16x1xi1> to vector<16x1xi1>
    %13 = vector.broadcast %12 : vector<16x1xi1> to vector<16x16xi1>
    %14 = arith.select %13, %7, %11 : vector<16x16xi1>, vector<16x16xf32>
    %c0_3 = arith.constant 0 : index
    %c0_4 = arith.constant 0 : index
    %15 = vector.load %arg3[%c0_3, %c0_4] : memref<16x16xf32, #tpu.memory_space<vmem>>, vector<16x16xf32>
    %cst_5 = arith.constant dense<0.000000e+00> : vector<16x16xf32>
    %16 = tpu.matmul %14, %14, %cst_5 {dimension_numbers = #tpu.dot_dimension_numbers<[0], [0], [1], [1], [0, 1, 1, 1], [], []>} : vector<16x16xf32>, vector<16x16xf32>, vector<16x16xf32> -> vector<16x16xf32>
    %17 = arith.addf %15, %16 : vector<16x16xf32>
    %c0_6 = arith.constant 0 : index
    %c0_7 = arith.constant 0 : index
    %18 = vector.load %arg3[%c0_6, %c0_7] : memref<16x16xf32, #tpu.memory_space<vmem>>, vector<16x16xf32>
    tpu.vector_store %arg3[%c0_6, %c0_7], %17 {strides = array<i32>} : memref<16x16xf32, #tpu.memory_space<vmem>>, vector<16x16xf32>,
    %c0_8 = arith.constant 0 : index
    %c0_9 = arith.constant 0 : index
    %19 = vector.load %arg4[%c0_8, %c0_9] : memref<1x16xf32, #tpu.memory_space<vmem>>, vector<1x16xf32>
    %cst_10 = arith.constant dense<0.000000e+00> : vector<16xf32>
    %20 = vector.multi_reduction <add>, %14, %cst_10 [0] : vector<16x16xf32> to vector<16xf32>
    %21 = vector.shape_cast %20 : vector<16xf32> to vector<1x16xf32>
    %22 = arith.addf %19, %21 : vector<1x16xf32>
    %c0_11 = arith.constant 0 : index
    %c0_12 = arith.constant 0 : index
    %23 = vector.load %arg4[%c0_11, %c0_12] : memref<1x16xf32, #tpu.memory_space<vmem>>, vector<1x16xf32>
    tpu.vector_store %arg4[%c0_11, %c0_12], %22 {strides = array<i32>} : memref<1x16xf32, #tpu.memory_space<vmem>>, vector<1x16xf32>,
    return
  }
  func.func @transform_0(%arg0: i32, %arg1: memref<1xi32, #tpu.memory_space<smem>>) -> (i32, i32) {
    %c0_i32 = arith.constant 0 : i32
    %c0_i32_0 = arith.constant 0 : i32
    return %arg0, %c0_i32 : i32, i32
  }
  func.func @transform_1(%arg0: i32, %arg1: memref<1xi32, #tpu.memory_space<smem>>) -> (i32, i32) {
    %c0_i32 = arith.constant 0 : i32
    %c0_i32_0 = arith.constant 0 : i32
    %c0_i32_1 = arith.constant 0 : i32
    return %c0_i32, %c0_i32_0 : i32, i32
  }
  func.func @transform_2(%arg0: i32, %arg1: memref<1xi32, #tpu.memory_space<smem>>) -> (i32, i32) {
    %c0_i32 = arith.constant 0 : i32
    %c0_i32_0 = arith.constant 0 : i32
    %c0_i32_1 = arith.constant 0 : i32
    return %c0_i32, %c0_i32_0 : i32, i32
  }
}

</mosaic_0001>

<bundles_post_ra>
// kernel: tpu_custom_call.1
= control target key start
LH: loop header
LB: loop body
LE: loop exit
PB: predicated region body
PF: predicated region fallthrough
CT: control target
= control target key end

     0   :  { %10 = vsyncpa [#allocation5], 0  ;;  %s359_s0 = inlined_call_operand.<no memory space> [shape: s32[1], index: 0, kind: input, shape index: {}]   ;;  %s360_s1 = inlined_call_operand.hbm [shape: f32[16,16], index: 1, kind: input, shape index: {}]   ;;  %s361_s2 = inlined_call_operand.hbm [shape: f32[16,16], index: 2, kind: output, shape index: {0}]   ;;  %s362_s3 = inlined_call_operand.hbm [shape: f32[1,16], index: 3, kind: output, shape index: {1}]  }
   0x1   :  { %11 = vsyncpa [#allocation6], 0 }
   0x2   :  { %12 = vsyncpa [#allocation9], 0  ;;  %s307_s12 = smov [#allocation4]  }
   0x3   :  { %s18_s13 = sshll.u32 %s307_s12, 4  ;;  %s19_s13 = int_to_ptr.vmem [resolvable:$true] %s18_s13 }
   0x4   :  { %s249_s14 = scalar_lea.vmem %s19_s13, 256  ;;  %p254_p1 = scmp.lt.s32.totalorder %s19_s13, %s19_s13 }
   0x5   :  { %p250_p0 = scmp.ne.s32.totalorder %s19_s13, %s249_s14  ;;  %p255_p2 = scmp.lt.s32.totalorder %s249_s14, %s249_s14 }
   0x7   :  { %p256_p3 = por %p255_p2, %p254_p1 }
   0x9   :  { %p257_p4 = pnand %p256_p3, %p250_p0 }
   0xb   :  { %260 = shalt.err (!%p257_p4)
}
   0xc   :  { %s308_s15 = smov 128   ;;  %s309_s16 = smov 8  }
   0xd   :  { %24 = dma.hbm_to_vmem [thread:$0]  %s360_s1, 256, %s19_s13, [#allocation5], %s308_s15, %s308_s15, %s309_s16  }
   0xe   :  { %301 = dma.done.wait [#allocation5], 256  }
   0xf   :  { %302 = vsyncadd [#allocation5], 4294967040  ;;  %v38_v0 = vlaneseq  ;;  %v47_v2 = vstv %s359_s0  ;;  %v44_v4 = vld [vmem:[#allocation4] sm:$0xff]  ;;  %v45_v5 = vld [vmem:[#allocation4 + $0x8] sm:$0xff]  ;;  %vm32_vm2 = vcmask 130048   ;;  %v310_v11 = vmov 0.0  }
  0x10   :  { %34 = vst.msk [vmem:[#allocation7 + $0x8] sm:$0xff] %vm32_vm2, %v310_v11  ;;  %33 = vst.msk [vmem:[#allocation7] sm:$0xff] %vm32_vm2, %v310_v11  ;;  %vm35_vm3 = vcmask 122880   ;;  %s311_s0 = smov [#allocation8]  }
  0x11   :  { %v39_v1 = vshrl.u32 %v38_v0, 7  ;;  %36 = vst.msk [vmem:[#allocation8] sm:$0x1] %vm35_vm3, %v310_v11  ;;  %s207_s1 = sshll.u32 %s311_s0, 4  ;;  %s208_s1 = int_to_ptr.vmem [resolvable:$true] %s207_s1 }
  0x12   :  { %s261_s21 = scalar_lea.vmem %s208_s1, 16  ;;  %s265_s22 = scalar_lea.vmem %s208_s1, 32 }
  0x13   :  { %v40_v3 = vadd.s32 8, %v39_v1  ;;  %vm48_vm0 = vcmp.lt.s32.totalorder %v39_v1, %v47_v2  ;;  %p262_p5 = scmp.ne.s32.totalorder %s208_s1, %s261_s21  ;;  %p266_p6 = scmp.lt.s32.totalorder %s208_s1, %s208_s1 }
  0x14   :  { %v54_v6 = vsel %vm48_vm0, %v44_v4, 0.0  ;;  %p267_p7 = scmp.lt.s32.totalorder %s265_s22, %s261_s21 }
  0x15   :  { %vm49_vm1 = vcmp.lt.s32.totalorder %v40_v3, %v47_v2  ;;  %58 = vxpose.xlu0.b32.start [1/2] (short) (narrow) %v54_v6, 16  ;;  %v177_v8 = vsel %vm32_vm2, %v54_v6, 0.0 }
  0x16   :  { %v55_v7 = vsel %vm49_vm1, %v45_v5, 0.0  ;;  %228 = vmatprep.subr.msk.mxu0 %vm49_vm1, %v45_v5  ;;  %p268_p8 = por %p267_p7, %p266_p6 }
  0x17   :  { %v178_v9 = vsel %vm32_vm2, %v55_v7, 0.0  ;;  %229 = vmatpush3.msk.msra.mxu0 %vm49_vm1, %v45_v5 }
  0x18   :  { %v179_v10 = vadd.f32 %v178_v9, %v177_v8  ;;  %230 = vmatprep.subr.msk.mxu0 %vm48_vm0, %v44_v4  ;;  %v176_v20 = vld [vmem:[#allocation8] sm:$0x1]  ;;  %p269_p9 = pnand %p268_p8, %p262_p5 }
  0x19   :  { %231 = vmatpush3.msk.msra.mxu0 %vm48_vm0, %v44_v4  ;;  %59 = vxpose.xlu0.b32.end [2/2] (short) (narrow) %v55_v7, 16 }
  0x1a   :  { %v180_v14 = vrot.slane %v179_v10, 4 }
  0x1c   :  { %v181_v15 = vadd.f32 %v180_v14, %v179_v10 }
  0x1e   :  { %v182_v16 = vrot.slane %v181_v15, 2 }
  0x20   :  { %v183_v17 = vadd.f32 %v182_v16, %v181_v15 }
  0x22   :  { %v184_v18 = vrot.slane %v183_v17, 1 }
  0x24   :  { %v185_v19 = vadd.f32 %v184_v18, %v183_v17 }
  0x26   :  { %v186_v21 = vadd.f32 %v185_v19, %v176_v20 }
  0x28   :  { %188 = vst.msk [vmem:[#allocation8] sm:$0x1] %vm35_vm3, %v186_v21 }
  0x91   :  { %v74_v12 = vpop.trf.xlu0 }
  0x92   :  { %232 = vmatprep.mubr.msk.f32.mxu0 %vm32_vm2, %v74_v12 }
  0x95   :  { %v75_v13 = vpop.trf.xlu0 }
  0x96   :  { %233 = vmatmul.mubr.msk.f32.vlgmr.msra.gmra.mxu0 %vm32_vm2, %v75_v13 }
  0x97   :  { %272 = shalt.err (!%p269_p9)
}
  0x98   :  { %210 = dma.vmem_to_hbm [thread:$0]  %s208_s1, 16, %s362_s3, [#allocation9]   ;;  %v57_v22 = vld [vmem:[#allocation7 + $0x8] sm:$0xff]  ;;  %v56_v24 = vld [vmem:[#allocation7] sm:$0xff] }
  0x99   :  { %s312_s25 = smov [#allocation7]  }
  0x9a   :  { %s194_s26 = sshll.u32 %s312_s25, 4  ;;  %s195_s26 = int_to_ptr.vmem [resolvable:$true] %s194_s26 }
  0x9b   :  { %s281_s27 = scalar_lea.vmem %s195_s26, 256  ;;  %p286_p11 = scmp.lt.s32.totalorder %s195_s26, %s195_s26 }
  0x9c   :  { %p282_p10 = scmp.ne.s32.totalorder %s195_s26, %s281_s27  ;;  %p287_p12 = scmp.lt.s32.totalorder %s281_s27, %s281_s27 }
  0x9e   :  { %p288_p13 = por %p287_p12, %p286_p11 }
  0xa0   :  { %p289_p0 = pnand %p288_p13, %p282_p10 }
 0x156   :  { %v234_v23 = vpop.f32.mrf.mxu0 }
 0x157   :  { %v173_v25 = vadd.f32 %v234_v23, %v57_v22 }
 0x158   :  { %v163_v26 = vpop.f32.mrf.mxu0 }
 0x159   :  { %175 = vst.msk [vmem:[#allocation7 + $0x8] sm:$0xff] %vm32_vm2, %v173_v25  ;;  %v172_v27 = vadd.f32 %v163_v26, %v56_v24 }
 0x15b   :  { %174 = vst.msk [vmem:[#allocation7] sm:$0xff] %vm32_vm2, %v172_v27 }
 0x15c   :  { %292 = shalt.err (!%p289_p0)
}
 0x15d   :  { %200 = dma.vmem_to_hbm [thread:$0]  %s195_s26, 256, %s361_s2, [#allocation6], %s308_s15, %s308_s15, %s309_s16  }
 0x15e   :  { %303 = dma.done.wait [#allocation6], 256  }
 0x15f   :  { %304 = vsyncadd [#allocation6], 4294967040 }
 0x160   :  { %305 = dma.done.wait [#allocation9], 16  }
 0x161   :  { %306 = vsyncadd [#allocation9], 4294967280 }
 0x162   :  { %217 = vsyncpa [#allocation5], 1 }
 0x163   :  { %218 = vsyncpa [#allocation6], 1 }
 0x164   :  { %219 = vsyncpa [#allocation9], 1 }

</bundles_post_ra>
